<compile_context>
chip_gen: v7x
topology: tpu7x:2x2x1
jax: 0.10.0
libtpu: 0.0.40
codegen_flags: <defaults>
</compile_context>

<pallas_src>
import numpy as np
import jax
import jax.numpy as jnp
from jax.experimental import pallas as pl
from jax.experimental.pallas import tpu as pltpu


def attn_global_kernel(x_ref, qt_ref, wkv_ref, bkv_ref, wp_ref, bp_ref, o_ref):
    # Per grid step: Bb independent instances.
    Bb, n, dim = x_ref.shape

    # Fused k/v projection: one (Bb*n, dim) @ (dim, 2*dim) MXU pass.
    # The (Bb, n, dim) -> (Bb*n, dim) merge is layout-preserving (dim stays on
    # lanes, n is a multiple of 8), so it costs nothing.
    x2 = x_ref[...].reshape(Bb * n, dim)                               # bf16
    kv = jnp.dot(x2, wkv_ref[...],
                 preferred_element_type=jnp.float32) + bkv_ref[...]   # f32 (Bb*n, 2*dim)

    # k already carries the 1/sqrt(dim) scale (folded into the k columns of
    # wkv in the wrapper).  Slices at the lane-aligned 128 boundary are free.
    k = kv[:, :dim].reshape(Bb, n, dim).astype(jnp.bfloat16)
    v = kv[:, dim:].reshape(Bb, n, dim).astype(jnp.bfloat16)

    # logits = k_scaled @ q^T; q is pre-transposed to (dim, n) in the wrapper
    # so the MXU contracts (last, first) with no in-kernel XLU transpose.
    logits = jnp.einsum('bnd,bdm->bnm', k, qt_ref[...],
                        preferred_element_type=jnp.float32)           # (Bb, n, n) f32

    # Numerically stable softmax in f32; divide goes to the EUP (approx recip).
    m = jnp.max(logits, axis=-1, keepdims=True)
    e = jnp.exp(logits - m)
    denom = jnp.sum(e, axis=-1, keepdims=True)
    attn = e * pl.reciprocal(denom, approx=True)                       # (Bb, n, n)
    # attn_drop is identity (p=0 / eval)
    # TODO(synk): kv-tiled online softmax here once n^2 temporaries approach
    # the scoped VMEM limit (matters first on v7x's 64 MiB core).

    out1 = jnp.einsum('bnm,bmd->bnd', attn.astype(jnp.bfloat16), v,
                      preferred_element_type=jnp.float32)              # (Bb, n, dim) f32

    out2 = jnp.dot(out1.reshape(Bb * n, dim).astype(jnp.bfloat16), wp_ref[...],
                   preferred_element_type=jnp.float32) + bp_ref[...]
    # proj_drop is identity (p=0 / eval)
    o_ref[...] = out2.reshape(Bb, n, dim).astype(o_ref.dtype)


def _pick_block_batch(B, n, dim, vmem_budget=24 << 20):
    """Largest divisor of B that (a) keeps >= 2 grid steps when possible (so
    both v7x TensorCores get work) and (b) fits a conservative VMEM estimate
    (double-buffered x/q/out blocks + (n,n) softmax temporaries + weights)."""
    def fits(bb):
        io = 2 * (2 * bb * n * dim * 2) + 2 * bb * n * dim * 4   # x,q (bf16) + out (f32), double-buffered
        tmp = 3 * bb * n * n * 4 + 4 * bb * n * dim * 4          # logits/e/attn + kv/out temporaries
        w = 3 * dim * dim * 2 + 3 * dim * 4
        return io + tmp + w <= vmem_budget
    divisors = [d for d in range(1, B + 1) if B % d == 0 and fits(d)]
    if not divisors:
        return 1
    multi_step = [d for d in divisors if B // d >= 2]
    return max(multi_step) if multi_step else max(divisors)


def attn_global(x, q_global, w_kv, b_kv, w_proj, b_proj, block_batch=None):
    """Batched AttnGlobal forward.

    x, q_global : (B, n, dim)  -- B independent instances of the module
    w_kv        : (2*dim, dim) PyTorch (out, in);   b_kv : (2*dim,)
    w_proj      : (dim, dim)   PyTorch (out, in);   b_proj : (dim,)
    returns     : (B, n, dim) in x.dtype
    """
    B, n, dim = x.shape
    assert q_global.shape == (B, n, dim)
    scale = 1.0 / np.sqrt(dim)

    Bb = block_batch if block_batch is not None else _pick_block_batch(B, n, dim)
    assert B % Bb == 0, (B, Bb)

    # Constant-parameter preprocessing (trace-time, free per invocation):
    #  * fuse k/v projections into one (dim, 2*dim) weight in (in, out) layout
    #  * fold 1/sqrt(dim) into the k half  (k/s @ q^T == k @ (q/s)^T)
    #  * bf16 MXU operands; biases stay f32 (added to the f32 accumulators)
    wkv_t = jnp.concatenate([w_kv[:dim, :].T * scale,
                             w_kv[dim:, :].T], axis=1).astype(jnp.bfloat16)   # (dim, 2*dim)
    bkv = jnp.concatenate([b_kv[:dim] * scale,
                           b_kv[dim:]]).reshape(1, 2 * dim).astype(jnp.float32)
    wp_t = w_proj.T.astype(jnp.bfloat16)                                      # (dim, dim)
    bp = b_proj.reshape(1, dim).astype(jnp.float32)

    x_bf = x.astype(jnp.bfloat16)
    # Pre-transpose q so the in-kernel logits matmul is NN (no XLU transpose).
    qt_bf = jnp.swapaxes(q_global, 1, 2).astype(jnp.bfloat16)                 # (B, dim, n)

    # Per-step blocks of Bb instances; weights/biases are grid-invariant.
    inst_in = pl.BlockSpec((Bb, n, dim), lambda b: (b, 0, 0))
    qt_spec = pl.BlockSpec((Bb, dim, n), lambda b: (b, 0, 0))
    # NOTE: pipeline_mode=pl.Buffered(1) on the four constant specs would drop
    # their second VMEM buffer (~192 KiB here); left at default for portability.
    wkv_spec = pl.BlockSpec((dim, 2 * dim), lambda b: (0, 0))
    bkv_spec = pl.BlockSpec((1, 2 * dim), lambda b: (0, 0))
    wp_spec = pl.BlockSpec((dim, dim), lambda b: (0, 0))
    bp_spec = pl.BlockSpec((1, dim), lambda b: (0, 0))
    out_spec = pl.BlockSpec((Bb, n, dim), lambda b: (b, 0, 0))

    return pl.pallas_call(
        attn_global_kernel,
        out_shape=jax.ShapeDtypeStruct((B, n, dim), x.dtype),
        grid_spec=pltpu.PrefetchScalarGridSpec(
            num_scalar_prefetch=0,
            grid=(B // Bb,),
            in_specs=[inst_in, qt_spec,
                      wkv_spec, bkv_spec,   # fused kv projection
                      wp_spec, bp_spec],    # output projection
            out_specs=out_spec,
        ),
        compiler_params=pltpu.CompilerParams(
            dimension_semantics=("parallel",)),
    )(x_bf, qt_bf, wkv_t, bkv, wp_t, bp)


def attn_global_ref(x, q_global, w_kv, b_kv, w_proj, b_proj):
    """Pure-JAX (f32) reference mirroring the PyTorch forward, per instance."""
    dim = x.shape[-1]
    kv = jnp.einsum('bnd,ed->bne', x, w_kv) + b_kv        # (B, n, 2*dim)
    k, v = kv[..., :dim], kv[..., dim:]
    q = q_global / np.sqrt(dim)
    attn = jax.nn.softmax(jnp.einsum('bnd,bmd->bnm', k, q), axis=-1)
    out1 = jnp.einsum('bnm,bmd->bnd', attn, v)
    return jnp.einsum('bnd,ed->bne', out1, w_proj) + b_proj


if __name__ == "__main__":
    # 4 instances; n multiple of 8, dim=128 keeps everything lane-dense.
    B, n, dim = 4, 64, 128

    key = jax.random.PRNGKey(0)
    kx, kq, kwkv, kbkv, kwp, kbp = jax.random.split(key, 6)

    x = jax.random.normal(kx, (B, n, dim), dtype=jnp.float32)
    q_global = jax.random.normal(kq, (B, n, dim), dtype=jnp.float32)

    # PyTorch nn.Linear convention: W is (out_features, in_features).
    w_kv = jax.random.normal(kwkv, (2 * dim, dim), dtype=jnp.float32) * 0.05
    b_kv = jax.random.normal(kbkv, (2 * dim,), dtype=jnp.float32) * 0.05
    w_proj = jax.random.normal(kwp, (dim, dim), dtype=jnp.float32) * 0.05
    b_proj = jax.random.normal(kbp, (dim,), dtype=jnp.float32) * 0.05

    out = attn_global(x, q_global, w_kv, b_kv, w_proj, b_proj)
    out = jax.block_until_ready(out)

    ref = attn_global_ref(x, q_global, w_kv, b_kv, w_proj, b_proj)
    assert out.shape == (B, n, dim), out.shape
    # bf16 MXU operands + approx reciprocal in the softmax denominator
    # -> tolerance ~1e-2 vs. the pure-f32 reference.
    np.testing.assert_allclose(np.asarray(out), np.asarray(ref),
                               rtol=1e-2, atol=1e-2)

    print("KERNEL_OK")
</pallas_src>

<mosaic_0001>
module attributes {stable_mosaic.version = 11 : i64} {
  func.func @attn_global_kernel(%arg0: i32, %arg1: memref<2x64x128xbf16, #tpu.memory_space<vmem>>, %arg2: memref<2x128x64xbf16, #tpu.memory_space<vmem>>, %arg3: memref<128x256xbf16, #tpu.memory_space<vmem>>, %arg4: memref<1x256xf32, #tpu.memory_space<vmem>>, %arg5: memref<128x128xbf16, #tpu.memory_space<vmem>>, %arg6: memref<1x128xf32, #tpu.memory_space<vmem>>, %arg7: memref<2x64x128xf32, #tpu.memory_space<vmem>>) attributes {dimension_semantics = [#tpu.dimension_semantics<parallel>], iteration_bounds = array<i64: 2>, scalar_prefetch = 0 : i64, scratch_operands = 0 : i64, tpu.core_type = #tpu.core_type<tc>, window_params = [{transform_indices = @transform_0, window_bounds = array<i64: 2, 64, 128>}, {transform_indices = @transform_1, window_bounds = array<i64: 2, 128, 64>}, {pipeline_mode = #tpu.pipeline_mode<synchronous>, transform_indices = @transform_2, window_bounds = array<i64: 128, 256>}, {pipeline_mode = #tpu.pipeline_mode<synchronous>, transform_indices = @transform_3, window_bounds = array<i64: 1, 256>}, {pipeline_mode = #tpu.pipeline_mode<synchronous>, transform_indices = @transform_4, window_bounds = array<i64: 128, 128>}, {pipeline_mode = #tpu.pipeline_mode<synchronous>, transform_indices = @transform_5, window_bounds = array<i64: 1, 128>}, {transform_indices = @transform_6, window_bounds = array<i64: 2, 64, 128>}]} {
    %c0 = arith.constant 0 : index
    %c0_0 = arith.constant 0 : index
    %c0_1 = arith.constant 0 : index
    %0 = vector.load %arg1[%c0, %c0_0, %c0_1] : memref<2x64x128xbf16, #tpu.memory_space<vmem>>, vector<2x64x128xbf16>
    %1 = vector.shape_cast %0 : vector<2x64x128xbf16> to vector<128x128xbf16>
    %c0_2 = arith.constant 0 : index
    %c0_3 = arith.constant 0 : index
    %2 = vector.load %arg3[%c0_2, %c0_3] : memref<128x256xbf16, #tpu.memory_space<vmem>>, vector<128x256xbf16>
    %cst = arith.constant dense<0.000000e+00> : vector<128x256xf32>
    %3 = tpu.matmul %1, %2, %cst {dimension_numbers = #tpu.dot_dimension_numbers<[1], [0], [0], [1], [0, 0, 1, 1], [], []>} : vector<128x128xbf16>, vector<128x256xbf16>, vector<128x256xf32> -> vector<128x256xf32>
    %c0_4 = arith.constant 0 : index
    %c0_5 = arith.constant 0 : index
    %4 = vector.load %arg4[%c0_4, %c0_5] : memref<1x256xf32, #tpu.memory_space<vmem>>, vector<1x256xf32>
    %5 = vector.broadcast %4 : vector<1x256xf32> to vector<128x256xf32>
    %6 = arith.addf %3, %5 : vector<128x256xf32>
    %7 = vector.extract_strided_slice %6 {offsets = [0, 0], sizes = [128, 128], strides = [1, 1]} : vector<128x256xf32> to vector<128x128xf32>
    %8 = vector.shape_cast %7 : vector<128x128xf32> to vector<2x64x128xf32>
    %9 = arith.truncf %8 : vector<2x64x128xf32> to vector<2x64x128xbf16>
    %10 = vector.extract_strided_slice %6 {offsets = [0, 128], sizes = [128, 128], strides = [1, 1]} : vector<128x256xf32> to vector<128x128xf32>
    %11 = vector.shape_cast %10 : vector<128x128xf32> to vector<2x64x128xf32>
    %12 = arith.truncf %11 : vector<2x64x128xf32> to vector<2x64x128xbf16>
    %c0_6 = arith.constant 0 : index
    %c0_7 = arith.constant 0 : index
    %c0_8 = arith.constant 0 : index
    %13 = vector.load %arg2[%c0_6, %c0_7, %c0_8] : memref<2x128x64xbf16, #tpu.memory_space<vmem>>, vector<2x128x64xbf16>
    "tpu.trace_start"() <{level = 10 : i32, message = "bnd,bdm->bnm"}> : () -> ()
    %cst_9 = arith.constant dense<0.000000e+00> : vector<2x64x64xf32>
    %14 = tpu.matmul %9, %13, %cst_9 {dimension_numbers = #tpu.dot_dimension_numbers<[2], [1], [1], [2], [0, 0, 0, 1, 1, 2], [0], [0]>} : vector<2x64x128xbf16>, vector<2x128x64xbf16>, vector<2x64x64xf32> -> vector<2x64x64xf32>
    "tpu.trace_stop"() : () -> ()
    %cst_10 = arith.constant dense<0xFF800000> : vector<2x64xf32>
    %15 = vector.multi_reduction <maximumf>, %14, %cst_10 [2] : vector<2x64x64xf32> to vector<2x64xf32>
    %16 = vector.shape_cast %15 : vector<2x64xf32> to vector<2x64x1xf32>
    %17 = vector.broadcast %16 : vector<2x64x1xf32> to vector<2x64x64xf32>
    %18 = arith.subf %14, %17 : vector<2x64x64xf32>
    %19 = math.exp %18 : vector<2x64x64xf32>
    %cst_11 = arith.constant dense<0.000000e+00> : vector<2x64xf32>
    %20 = vector.multi_reduction <add>, %19, %cst_11 [2] : vector<2x64x64xf32> to vector<2x64xf32>
    %21 = vector.shape_cast %20 : vector<2x64xf32> to vector<2x64x1xf32>
    %22 = tpu.reciprocal %21 {approx = true} : vector<2x64x1xf32> -> vector<2x64x1xf32>
    %23 = vector.broadcast %22 : vector<2x64x1xf32> to vector<2x64x64xf32>
    %24 = arith.mulf %19, %23 : vector<2x64x64xf32>
    %25 = arith.truncf %24 : vector<2x64x64xf32> to vector<2x64x64xbf16>
    "tpu.trace_start"() <{level = 10 : i32, message = "bnm,bmd->bnd"}> : () -> ()
    %cst_12 = arith.constant dense<0.000000e+00> : vector<2x64x128xf32>
    %26 = tpu.matmul %25, %12, %cst_12 {dimension_numbers = #tpu.dot_dimension_numbers<[2], [1], [1], [2], [0, 0, 0, 1, 1, 2], [0], [0]>} : vector<2x64x64xbf16>, vector<2x64x128xbf16>, vector<2x64x128xf32> -> vector<2x64x128xf32>
    "tpu.trace_stop"() : () -> ()
    %27 = vector.shape_cast %26 : vector<2x64x128xf32> to vector<128x128xf32>
    %28 = arith.truncf %27 : vector<128x128xf32> to vector<128x128xbf16>
    %c0_13 = arith.constant 0 : index
    %c0_14 = arith.constant 0 : index
    %29 = vector.load %arg5[%c0_13, %c0_14] : memref<128x128xbf16, #tpu.memory_space<vmem>>, vector<128x128xbf16>
    %cst_15 = arith.constant dense<0.000000e+00> : vector<128x128xf32>
    %30 = tpu.matmul %28, %29, %cst_15 {dimension_numbers = #tpu.dot_dimension_numbers<[1], [0], [0], [1], [0, 0, 1, 1], [], []>} : vector<128x128xbf16>, vector<128x128xbf16>, vector<128x128xf32> -> vector<128x128xf32>
    %c0_16 = arith.constant 0 : index
    %c0_17 = arith.constant 0 : index
    %31 = vector.load %arg6[%c0_16, %c0_17] : memref<1x128xf32, #tpu.memory_space<vmem>>, vector<1x128xf32>
    %32 = vector.broadcast %31 : vector<1x128xf32> to vector<128x128xf32>
    %33 = arith.addf %30, %32 : vector<128x128xf32>
    %34 = vector.shape_cast %33 : vector<128x128xf32> to vector<2x64x128xf32>
    %c0_18 = arith.constant 0 : index
    %c0_19 = arith.constant 0 : index
    %c0_20 = arith.constant 0 : index
    %35 = vector.load %arg7[%c0_18, %c0_19, %c0_20] : memref<2x64x128xf32, #tpu.memory_space<vmem>>, vector<2x64x128xf32>
    tpu.vector_store %arg7[%c0_18, %c0_19, %c0_20], %34 {strides = array<i32>} : memref<2x64x128xf32, #tpu.memory_space<vmem>>, vector<2x64x128xf32>,
    return
  }
  func.func @transform_0(%arg0: i32) -> (i32, i32, i32) {
    %c0_i32 = arith.constant 0 : i32
    %c0_i32_0 = arith.constant 0 : i32
    %c0_i32_1 = arith.constant 0 : i32
    return %arg0, %c0_i32, %c0_i32_0 : i32, i32, i32
  }
  func.func @transform_1(%arg0: i32) -> (i32, i32, i32) {
    %c0_i32 = arith.constant 0 : i32
    %c0_i32_0 = arith.constant 0 : i32
    %c0_i32_1 = arith.constant 0 : i32
    return %arg0, %c0_i32, %c0_i32_0 : i32, i32, i32
  }
  func.func @transform_2(%arg0: i32) -> (i32, i32) {
    %c0_i32 = arith.constant 0 : i32
    %c0_i32_0 = arith.constant 0 : i32
    %c0_i32_1 = arith.constant 0 : i32
    return %c0_i32, %c0_i32_0 : i32, i32
  }
  func.func @transform_3(%arg0: i32) -> (i32, i32) {
    %c0_i32 = arith.constant 0 : i32
    %c0_i32_0 = arith.constant 0 : i32
    %c0_i32_1 = arith.constant 0 : i32
    return %c0_i32, %c0_i32_0 : i32, i32
  }
  func.func @transform_4(%arg0: i32) -> (i32, i32) {
    %c0_i32 = arith.constant 0 : i32
    %c0_i32_0 = arith.constant 0 : i32
    %c0_i32_1 = arith.constant 0 : i32
    return %c0_i32, %c0_i32_0 : i32, i32
  }
  func.func @transform_5(%arg0: i32) -> (i32, i32) {
    %c0_i32 = arith.constant 0 : i32
    %c0_i32_0 = arith.constant 0 : i32
    %c0_i32_1 = arith.constant 0 : i32
    return %c0_i32, %c0_i32_0 : i32, i32
  }
  func.func @transform_6(%arg0: i32) -> (i32, i32, i32) {
    %c0_i32 = arith.constant 0 : i32
    %c0_i32_0 = arith.constant 0 : i32
    %c0_i32_1 = arith.constant 0 : i32
    return %arg0, %c0_i32, %c0_i32_0 : i32, i32, i32
  }
}

</mosaic_0001>

<bundles_post_ra>
// kernel: tpu_custom_call.1
= control target key start
LH: loop header
LB: loop body
LE: loop exit
PB: predicated region body
PF: predicated region fallthrough
CT: control target
= control target key end

     0   :  { %11 = vsyncpa [#allocation3], 0  ;;  %s2394_s0 = inlined_call_operand.vmem [shape: bf16[4,64,128], index: 0, kind: input, shape index: {}]   ;;  %s2395_s1 = inlined_call_operand.vmem [shape: bf16[4,128,64], index: 1, kind: input, shape index: {}]   ;;  %s2396_s2 = inlined_call_operand.vmem [shape: bf16[128,256], index: 2, kind: input, shape index: {}]   ;;  %s2397_s3 = inlined_call_operand.vmem [shape: f32[1,256], index: 3, kind: input, shape index: {}]   ;;  %s2398_s4 = inlined_call_operand.vmem [shape: bf16[128,128], index: 4, kind: input, shape index: {}]   ;;  %s2399_s5 = inlined_call_operand.vmem [shape: f32[1,128], index: 5, kind: input, shape index: {}]   ;;  %s2400_s6 = inlined_call_operand.hbm [shape: f32[4,64,128], index: 6, kind: output, shape index: {}]  }
   0x1   :  { %13 = vsyncpa [#allocation3 + $0x1], 0  ;;  %s1972_s21 = smov 0   ;;  %s1974_s22 = smov 0  }
   0x2   :  { %s1976_s23 = smov 0   ;;  %s1978_s24 = smov 0  }
   0x3 LB: > { %s1993_s25 = sadd.s32 4294967295, %s1931_s24   ;;  %s1461_s26 = sadd.s32 4294967294, %s1931_s24   ;;  %s1931_s24 = sphi %s1978_s24, %s2406_s24   ;;  %s1927_s23 = sphi %s1976_s23, %s2405_s23   ;;  %s1923_s22 = sphi %s1974_s22, %s2404_s22   ;;  %s1919_s21 = sphi %s1972_s21, %s2403_s21  }
   0x4   : > { %s1997_s27 = sadd.s32 1, %s1931_s24   ;;  %s162_s28 = sadd.s32 1, %s1927_s23 }
   0x5   : > { %s159_s29 = ssub.s32 %s1931_s24, %s1997_s27  ;;  %p172_p0 = scmp.ne.s32.totalorder %s1927_s23, %s1923_s22 }
   0x6   : > { %p160_p1 = scmp.eq.s32.totalorder %s159_s29, 0  ;;  %p173_p2 = scmp.eq.s32.totalorder %s1993_s25, 1 }
   0x7   : > { %p178_p3 = scmp.ne.s32.totalorder %s1923_s22, %s1919_s21  ;;  %p179_p4 = scmp.eq.s32.totalorder %s1461_s26, 1 }
   0x8   : > { %s2008_s30 = scalar_select %p160_p1, %s1927_s23, %s162_s28  }
   0x9   : > { %p2010_p5 = por %p173_p2, %p172_p0  ;;  %p2014_p6 = por %p179_p4, %p178_p3 }
   0xa   : > { %p1464_p7 = scmp.ge.s32.totalorder %s1931_s24, 1  ;;  %p229_p8 = scmp.lt.s32.totalorder %s1931_s24, 3 }
   0xc   : > { %p230_p9 = pnand %p1464_p7, %p229_p8 }
   0xd   : > { %v1749_v0 = vld [vmem:[%s2396_s2 + $0x4] ss:$8 sps:$4 sm:$0xff] (!%p230_p9)   ;;  %s1466_s11 = sshll.u32 (!%p230_p9), %s1993_s25, 1  ;;  %v1751_v1 = vld [vmem:[%s2396_s2] ss:$8 sps:$4 sm:$0xff] (!%p230_p9)   ;;  %v1933_v2 = vmov (!%p230_p9), 0   ;;  %v316_v41 = vlaneseq (!%p230_p9) }
   0xe   : > { %233 = sbr.rel (%p230_p9) target bundleno = 1305 (0x519), region = 44  ;;  %486 = vmatprep.mubr.bf16.mxu0 (!%p230_p9), %v1933_v2  ;;  %p267_p10 = scmp.lt.s32.totalorder (!%p230_p9), %s1466_s11, 3  ;;  %454 = vmatprep.subr.bf16.mxu0 (!%p230_p9), %v1749_v0  ;;  %v1752_v3 = vld [vmem:[%s2396_s2 + $0x14] ss:$8 sps:$4 sm:$0xff] (!%p230_p9)   ;;  %v1754_v4 = vld [vmem:[%s2396_s2 + $0x10] ss:$8 sps:$4 sm:$0xff] (!%p230_p9)  }
   0xf   : > { %455 = vmatpush1.bf16.msra.mxu0 (!%p230_p9), %v1751_v1  ;;  %v1755_v5 = vld [vmem:[%s2396_s2 + $0x24] ss:$8 sps:$4 sm:$0xff] (!%p230_p9)   ;;  %v1757_v6 = vld [vmem:[%s2396_s2 + $0x20] ss:$8 sps:$4 sm:$0xff] (!%p230_p9)   ;;  %v1758_v7 = vld [vmem:[%s2396_s2 + $0x34] ss:$8 sps:$4 sm:$0xff] (!%p230_p9)  }
  0x10   : > { %456 = vmatprep.subr.bf16.mxu0 (!%p230_p9), %v1752_v3  ;;  %v1760_v8 = vld [vmem:[%s2396_s2 + $0x30] ss:$8 sps:$4 sm:$0xff] (!%p230_p9)   ;;  %v1761_v9 = vld [vmem:[%s2396_s2 + $0x44] ss:$8 sps:$4 sm:$0xff] (!%p230_p9)   ;;  %v1763_v10 = vld [vmem:[%s2396_s2 + $0x40] ss:$8 sps:$4 sm:$0xff] (!%p230_p9)  }
  0x11   : > { %v1764_v11 = vld [vmem:[%s2396_s2 + $0x54] ss:$8 sps:$4 sm:$0xff] (!%p230_p9)   ;;  %v1766_v12 = vld [vmem:[%s2396_s2 + $0x50] ss:$8 sps:$4 sm:$0xff] (!%p230_p9)   ;;  %v1767_v13 = vld [vmem:[%s2396_s2 + $0x64] ss:$8 sps:$4 sm:$0xff] (!%p230_p9)  }
  0x12   : > { %v1769_v15 = vld [vmem:[%s2396_s2 + $0x60] ss:$8 sps:$4 sm:$0xff] (!%p230_p9)   ;;  %v1770_v17 = vld [vmem:[%s2396_s2 + $0x74] ss:$8 sps:$4 sm:$0xff] (!%p230_p9)   ;;  %v1772_v19 = vld [vmem:[%s2396_s2 + $0x70] ss:$8 sps:$4 sm:$0xff] (!%p230_p9)  }
  0x13   : > { %457 = vmatpush1.bf16.msra.mxu0 (!%p230_p9), %v1754_v4  ;;  %v317_v42 = vshrl.u32 (!%p230_p9), %v316_v41, 7  ;;  %v314_v44 = vld [vmem:[%s2397_s3] sm:$0x3] (!%p230_p9)  ;;  %vm841_vm0 = vcmask (!%p230_p9), 523264   ;;  %s263_s9 = sand.u32 (!%p230_p9), 1, %s1923_s22   ;;  %s1538_s15 = sshll.u32 (!%p230_p9), %s1993_s25, 11 }
  0x14   : > { %458 = vmatprep.subr.bf16.mxu0 (!%p230_p9), %v1755_v5  ;;  %s2344_s19 = scalar_lea.hbm (!%p230_p9), %s2400_s6, %s1538_s15  ;;  %s2353_s25 = scalar_lea.sflag (!%p230_p9), [#allocation3], %s263_s9 }
  0x15   : > { %s2408_s11 = smov (!%p267_p10, %s1466_s11), 3  ;;  %v318_v43 = vsub.s32 0, %v317_v42  ;;  %v322_v45 = vsub.s32 1, %v317_v42  ;;  %s1934_s28 = smov [#allocation2]  }
  0x16   : > { %s1535_s20 = sshll.u32 %s2408_s11, 5  ;;  %s1536_s18 = sshll.u32 %s2408_s11, 6 }
  0x17   : > { %s2046_s13 = scalar_lea.vmem %s2394_s0, %s1535_s20  ;;  %459 = vmatpush1.bf16.msra.mxu0 %v1757_v6  ;;  %s2063_s10 = scalar_lea.vmem %s2395_s1, %s1536_s18  ;;  %v2114_v46 = vrot.slane %v314_v44, %v318_v43  ;;  %v2116_v48 = vrot.slane %v314_v44, %v322_v45 }
  0x18   : > { %460 = vmatprep.subr.bf16.mxu0 %v1758_v7  ;;  %v1782_v14 = vld [vmem:[%s2063_s10 + $0x40] sm:$0xff]   ;;  %v1784_v16 = vld [vmem:[%s2063_s10 + $0x48] sm:$0xff]   ;;  %v1785_v18 = vld [vmem:[%s2063_s10 + $0x50] sm:$0xff]  }
  0x19   : > { %1619 = vmatprep.subr.bf16.mxu1 %v1782_v14  ;;  %v1781_v20 = vld [vmem:[%s2063_s10] sm:$0xff]   ;;  %v1787_v21 = vld [vmem:[%s2063_s10 + $0x58] sm:$0xff]   ;;  %v1783_v23 = vld [vmem:[%s2063_s10 + $0x8] sm:$0xff]  }
  0x1a   : > { %1620 = vmatpush3.bf16.msra.mxu1 %v1782_v14  ;;  %v1773_v22 = vld [vmem:[%s2046_s13] sm:$0xff]   ;;  %v1786_v25 = vld [vmem:[%s2063_s10 + $0x10] sm:$0xff]   ;;  %v1790_v26 = vld [vmem:[%s2063_s10 + $0x68] sm:$0xff]  }
  0x1b   : > { %461 = vmatpush1.bf16.msra.mxu0 %v1760_v8  ;;  %1621 = vmatprep.subr.bf16.mxu1 %v1784_v16  ;;  %v1788_v24 = vld [vmem:[%s2063_s10 + $0x60] sm:$0xff]   ;;  %v1774_v27 = vld [vmem:[%s2046_s13 + $0x8] sm:$0xff]   ;;  %v1789_v28 = vld [vmem:[%s2063_s10 + $0x18] sm:$0xff]  }
  0x1c   : > { %462 = vmatprep.subr.bf16.mxu0 %v1761_v9  ;;  %v1791_v29 = vld [vmem:[%s2063_s10 + $0x20] sm:$0xff]   ;;  %v1775_v30 = vld [vmem:[%s2046_s13 + $0x10] sm:$0xff]   ;;  %v1776_v31 = vld [vmem:[%s2046_s13 + $0x18] sm:$0xff]  }
  0x1d   : > { %v1777_v32 = vld [vmem:[%s2046_s13 + $0x20] sm:$0xff]   ;;  %v1778_v33 = vld [vmem:[%s2046_s13 + $0x28] sm:$0xff]   ;;  %v1779_v34 = vld [vmem:[%s2046_s13 + $0x30] sm:$0xff]  }
  0x1e   : > { %1622 = vmatpush3.bf16.msra.mxu1 %v1784_v16  ;;  %v1780_v35 = vld [vmem:[%s2046_s13 + $0x38] sm:$0xff]   ;;  %v1792_v36 = vld [vmem:[%s2063_s10 + $0x70] sm:$0xff]   ;;  %v1793_v37 = vld [vmem:[%s2063_s10 + $0x28] sm:$0xff]   ;;  %s1873_s13 = sshll.u32 %s1934_s28, 4  ;;  %s1874_s13 = int_to_ptr.vmem [resolvable:$false] %s1873_s13 }
  0x1f   : > { %463 = vmatpush1.bf16.msra.mxu0 %v1763_v10  ;;  %1623 = vmatprep.subr.bf16.mxu1 %v1785_v18  ;;  %v1794_v38 = vld [vmem:[%s2063_s10 + $0x78] sm:$0xff]   ;;  %v1795_v39 = vld [vmem:[%s2063_s10 + $0x30] sm:$0xff]   ;;  %s1875_s20 = scalar_lea.vmem %s1874_s13, 4096 }
  0x20   : > { %464 = vmatprep.subr.bf16.mxu0 %v1764_v11  ;;  %v1796_v40 = vld [vmem:[%s2063_s10 + $0x38] sm:$0xff]   ;;  %s1465_s10 = sshll.u32 %s263_s9, 7 }
  0x21   : > { %s2324_s11 = scalar_lea.vmem [#allocation2], %s1465_s10 }
  0x22   : > { %1624 = vmatpush3.bf16.msra.mxu1 %v1785_v18  ;;  %s1387_s16 = sshll.u32 %s2324_s11, 4  ;;  %s2346_s16 = int_to_ptr.vmem [resolvable:$true] %s1387_s16 }
  0x23   : > { %465 = vmatpush1.bf16.msra.mxu0 %v1766_v12  ;;  %1625 = vmatprep.subr.bf16.mxu1 %v1787_v21  ;;  %s1869_s26 = scalar_lea.vmem %s2346_s16, 2048  ;;  %p1876_p0 = scmp.lt.s32.totalorder %s2346_s16, %s1874_s13 }
  0x24   : > { %466 = vmatprep.subr.bf16.mxu0 %v1767_v13  ;;  %p1870_p11 = scmp.ne.s32.totalorder %s2346_s16, %s1869_s26  ;;  %p1877_p1 = scmp.lt.s32.totalorder %s1875_s20, %s1869_s26 }
  0x26   : > { %1626 = vmatpush3.bf16.msra.mxu1 %v1787_v21  ;;  %p1871_p12 = pnand %p1870_p11, %p2010_p5  ;;  %p1878_p2 = por %p1877_p1, %p1876_p0 }
  0x27   : > { %467 = vmatpush1.bf16.msra.mxu0 %v1769_v15  ;;  %1627 = vmatprep.subr.bf16.mxu1 %v1788_v24 }
  0x28   : > { %468 = vmatprep.subr.bf16.mxu0 %v1770_v17  ;;  %p1872_p13 = pneg %p1871_p12 }
  0x2a   : > { %1628 = vmatpush3.bf16.msra.mxu1 %v1788_v24  ;;  %p1879_p3 = pnand %p1878_p2, %p1872_p13 }
  0x2b   : > { %469 = vmatpush1.bf16.msra.mxu0 %v1772_v19  ;;  %1629 = vmatprep.subr.bf16.mxu1 %v1790_v26 }
  0x2c   : > { %1595 = vmatprep.subr.bf16.mxu0 %v1781_v20 }
  0x2e   : > { %487 = vmatmul.mubr.bf16.vlgmr.msra.gmra.mrb[0].mxu0 %v1773_v22  ;;  %1630 = vmatpush3.bf16.msra.mxu1 %v1790_v26 }
  0x2f   : > { %496 = vmatprep.mubr.bf16.mxu0 %v1933_v2  ;;  %1596 = vmatpush3.bf16.msra.mxu0 %v1781_v20 }
  0x30   : > { %1597 = vmatprep.subr.bf16.mxu0 %v1783_v23  ;;  %1631 = vmatprep.subr.bf16.mxu1 %v1792_v36 }
  0x32   : > { %1632 = vmatpush3.bf16.msra.mxu1 %v1792_v36 }
  0x33   : > { %1598 = vmatpush3.bf16.msra.mxu0 %v1783_v23  ;;  %1633 = vmatprep.subr.bf16.mxu1 %v1794_v38 }
  0x34   : > { %1599 = vmatprep.subr.bf16.mxu0 %v1786_v25 }
  0x36   : > { %497 = vmatmul.mubr.bf16.gmra.mrb[4].mxu0 %v1774_v27  ;;  %1634 = vmatpush3.bf16.msra.mxu1 %v1794_v38 }
  0x37   : > { %506 = vmatprep.mubr.bf16.mxu0 %v1933_v2  ;;  %1600 = vmatpush3.bf16.msra.mxu0 %v1786_v25 }
  0x38   : > { %1601 = vmatprep.subr.bf16.mxu0 %v1789_v28 }
  0x3b   : > { %1602 = vmatpush3.bf16.msra.mxu0 %v1789_v28 }
  0x3c   : > { %1603 = vmatprep.subr.bf16.mxu0 %v1791_v29 }
  0x3e   : > { %507 = vmatmul.mubr.bf16.gmra.mrb[8].mxu0 %v1775_v30 }
  0x3f   : > { %516 = vmatprep.mubr.bf16.mxu0 %v1933_v2  ;;  %1604 = vmatpush3.bf16.msra.mxu0 %v1791_v29 }
  0x40   : > { %1605 = vmatprep.subr.bf16.mxu0 %v1793_v37 }
  0x43   : > { %1606 = vmatpush3.bf16.msra.mxu0 %v1793_v37 }
  0x44   : > { %1607 = vmatprep.subr.bf16.mxu0 %v1795_v39 }
  0x46   : > { %517 = vmatmul.mubr.bf16.gmra.mrb[12].mxu0 %v1776_v31 }
  0x47   : > { %526 = vmatprep.mubr.bf16.mxu0 %v1933_v2  ;;  %1608 = vmatpush3.bf16.msra.mxu0 %v1795_v39 }
  0x48   : > { %1609 = vmatprep.subr.bf16.mxu0 %v1796_v40 }
  0x4b   : > { %1610 = vmatpush3.bf16.msra.mxu0 %v1796_v40 }
  0x4e   : > { %527 = vmatmul.mubr.bf16.gmra.mrb[16].mxu0 %v1777_v32 }
  0x4f   : > { %536 = vmatprep.mubr.bf16.mxu0 %v1933_v2 }
  0x56   : > { %537 = vmatmul.mubr.bf16.gmra.mrb[20].mxu0 %v1778_v33 }
  0x57   : > { %546 = vmatprep.mubr.bf16.mxu0 %v1933_v2 }
  0x5e   : > { %547 = vmatmul.mubr.bf16.gmra.mrb[24].mxu0 %v1779_v34 }
  0x5f   : > { %556 = vmatprep.mubr.bf16.mxu0 %v1933_v2 }
  0x66   : > { %557 = vmatmul.mubr.bf16.gmra.mrb[28].mxu0 %v1780_v35 }
 0x101   : > { %v488_v47 = vpop.f32.mrb[0].mxu0 }
 0x102   : > { %v490_v49 = vpop.f32.mrb[1].mxu0  ;;  %v489_v51 = vadd.f32 %v488_v47, %v2114_v46 }
 0x103   : > { %v492_v50 = vpop.f32.mrb[2].mxu0  ;;  %v491_v54 = vadd.f32 %v490_v49, %v2116_v48 }
 0x104   : > { %v493_v52 = vadd.f32 %v492_v50, %v2114_v46  ;;  %v494_v53 = vpop.f32.mrb[3].mxu0 }
 0x105   : > { %v495_v55 = vadd.f32 %v494_v53, %v2116_v48 }
 0x106   : > { %v567_v56 = vpack.c.bf16 %v493_v52, %v489_v51 }
 0x107   : > { %v575_v57 = vpack.c.bf16 %v495_v55, %v491_v54 }
 0x108   : > { %1611 = vmatprep.mubr.bf16.mxu0 %v567_v56 }
 0x109   : > { %v498_v58 = vpop.f32.mrb[4].mxu0  ;;  %1643 = vmatprep.subr.bf16.mxu1 %v575_v57 }
 0x10a   : > { %v500_v59 = vpop.f32.mrb[5].mxu0  ;;  %v499_v61 = vadd.f32 %v498_v58, %v2114_v46 }
 0x10b   : > { %v502_v60 = vpop.f32.mrb[6].mxu0  ;;  %v501_v0 = vadd.f32 %v500_v59, %v2116_v48 }
 0x10c   : > { %v503_v62 = vadd.f32 %v502_v60, %v2114_v46  ;;  %v504_v63 = vpop.f32.mrb[7].mxu0 }
 0x10d   : > { %v505_v1 = vadd.f32 %v504_v63, %v2116_v48 }
 0x10e   : > { %v568_v2 = vpack.c.bf16 %v503_v62, %v499_v61 }
 0x10f   : > { %v576_v3 = vpack.c.bf16 %v505_v1, %v501_v0 }
 0x110   : > { %1612 = vmatmul.mubr.bf16.vlgmr.msra.gmra.mrb[32].mxu0 %v568_v2 }
 0x111   : > { %v508_v4 = vpop.f32.mrb[8].mxu0 }
 0x112   : > { %v510_v5 = vpop.f32.mrb[9].mxu0  ;;  %v509_v7 = vadd.f32 %v508_v4, %v2114_v46 }
 0x113   : > { %v512_v6 = vpop.f32.mrb[10].mxu0  ;;  %v511_v10 = vadd.f32 %v510_v5, %v2116_v48 }
 0x114   : > { %v513_v8 = vadd.f32 %v512_v6, %v2114_v46  ;;  %v514_v9 = vpop.f32.mrb[11].mxu0 }
 0x115   : > { %v515_v11 = vadd.f32 %v514_v9, %v2116_v48 }
 0x116   : > { %v569_v12 = vpack.c.bf16 %v513_v8, %v509_v7 }
 0x117   : > { %v577_v13 = vpack.c.bf16 %v515_v11, %v511_v10 }
 0x118   : > { %1615 = vmatprep.mubr.bf16.mxu0 %v569_v12 }
 0x119   : > { %v518_v14 = vpop.f32.mrb[12].mxu0 }
 0x11a   : > { %v520_v15 = vpop.f32.mrb[13].mxu0  ;;  %v519_v17 = vadd.f32 %v518_v14, %v2114_v46 }
 0x11b   : > { %v522_v16 = vpop.f32.mrb[14].mxu0  ;;  %v521_v20 = vadd.f32 %v520_v15, %v2116_v48 }
 0x11c   : > { %v523_v18 = vadd.f32 %v522_v16, %v2114_v46  ;;  %v524_v19 = vpop.f32.mrb[15].mxu0 }
 0x11d   : > { %v525_v21 = vadd.f32 %v524_v19, %v2116_v48 }
 0x11e   : > { %v570_v22 = vpack.c.bf16 %v523_v18, %v519_v17 }
 0x11f   : > { %v578_v23 = vpack.c.bf16 %v525_v21, %v521_v20 }
 0x120   : > { %1616 = vmatmul.mubr.bf16.gmra.mrb[36].mxu0 %v570_v22 }
 0x121   : > { %v528_v24 = vpop.f32.mrb[16].mxu0 }
 0x122   : > { %v530_v25 = vpop.f32.mrb[17].mxu0  ;;  %v529_v27 = vadd.f32 %v528_v24, %v2114_v46 }
 0x123   : > { %v532_v26 = vpop.f32.mrb[18].mxu0  ;;  %v531_v30 = vadd.f32 %v530_v25, %v2116_v48 }
 0x124   : > { %v533_v28 = vadd.f32 %v532_v26, %v2114_v46  ;;  %v534_v29 = vpop.f32.mrb[19].mxu0 }
 0x125   : > { %v535_v31 = vadd.f32 %v534_v29, %v2116_v48 }
 0x126   : > { %v571_v32 = vpack.c.bf16 %v533_v28, %v529_v27 }
 0x127   : > { %v579_v33 = vpack.c.bf16 %v535_v31, %v531_v30 }
 0x128   : > { %1635 = vmatprep.mubr.bf16.mxu1 %v571_v32 }
 0x129   : > { %v538_v34 = vpop.f32.mrb[20].mxu0  ;;  %1659 = vmatprep.subr.bf16.mxu0 %v579_v33 }
 0x12a   : > { %v540_v35 = vpop.f32.mrb[21].mxu0  ;;  %1660 = vmatpush3.bf16.msra.mxu0 %v579_v33  ;;  %v539_v37 = vadd.f32 %v538_v34, %v2114_v46 }
 0x12b   : > { %v542_v36 = vpop.f32.mrb[22].mxu0  ;;  %v541_v40 = vadd.f32 %v540_v35, %v2116_v48 }
 0x12c   : > { %v543_v38 = vadd.f32 %v542_v36, %v2114_v46  ;;  %v544_v39 = vpop.f32.mrb[23].mxu0 }
 0x12d   : > { %v545_v41 = vadd.f32 %v544_v39, %v2116_v48 }
 0x12e   : > { %v572_v42 = vpack.c.bf16 %v543_v38, %v539_v37 }
 0x12f   : > { %v580_v43 = vpack.c.bf16 %v545_v41, %v541_v40 }
 0x130   : > { %1636 = vmatmul.mubr.bf16.vlgmr.msra.gmra.mrb[0].mxu1 %v572_v42 }
 0x131   : > { %1644 = vmatpush3.bf16.msra.mxu1 %v575_v57  ;;  %v548_v44 = vpop.f32.mrb[24].mxu0  ;;  %1661 = vmatprep.subr.bf16.mxu0 %v580_v43 }
 0x132   : > { %1645 = vmatprep.subr.bf16.mxu1 %v576_v3  ;;  %v550_v45 = vpop.f32.mrb[25].mxu0  ;;  %1662 = vmatpush3.bf16.msra.mxu0 %v580_v43  ;;  %v549_v49 = vadd.f32 %v548_v44, %v2114_v46 }
 0x133   : > { %v552_v47 = vpop.f32.mrb[26].mxu0  ;;  %v551_v52 = vadd.f32 %v550_v45, %v2116_v48 }
 0x134   : > { %v553_v50 = vadd.f32 %v552_v47, %v2114_v46  ;;  %v554_v51 = vpop.f32.mrb[27].mxu0 }
 0x135   : > { %v555_v53 = vadd.f32 %v554_v51, %v2116_v48  ;;  %1646 = vmatpush3.bf16.msra.mxu1 %v576_v3 }
 0x136   : > { %v573_v54 = vpack.c.bf16 %v553_v50, %v549_v49  ;;  %1647 = vmatprep.subr.bf16.mxu1 %v577_v13 }
 0x137   : > { %v581_v55 = vpack.c.bf16 %v555_v53, %v551_v52 }
 0x138   : > { %1639 = vmatprep.mubr.bf16.mxu1 %v573_v54 }
 0x139   : > { %1648 = vmatpush3.bf16.msra.mxu1 %v577_v13  ;;  %v558_v56 = vpop.f32.mrb[28].mxu0  ;;  %1663 = vmatprep.subr.bf16.mxu0 %v581_v55 }
 0x13a   : > { %1649 = vmatprep.subr.bf16.mxu1 %v578_v23  ;;  %v560_v57 = vpop.f32.mrb[29].mxu0  ;;  %1664 = vmatpush3.bf16.msra.mxu0 %v581_v55  ;;  %v559_v59 = vadd.f32 %v558_v56, %v2114_v46 }
 0x13b   : > { %v562_v58 = vpop.f32.mrb[30].mxu0  ;;  %v561_v62 = vadd.f32 %v560_v57, %v2116_v48 }
 0x13c   : > { %v563_v60 = vadd.f32 %v562_v58, %v2114_v46  ;;  %v564_v61 = vpop.f32.mrb[31].mxu0 }
 0x13d   : > { %v565_v63 = vadd.f32 %v564_v61, %v2116_v48  ;;  %1650 = vmatpush3.bf16.msra.mxu1 %v578_v23 }
 0x13e   : > { %v574_v0 = vpack.c.bf16 %v563_v60, %v559_v59 }
 0x13f   : > { %v582_v1 = vpack.c.bf16 %v565_v63, %v561_v62 }
 0x140   : > { %1640 = vmatmul.mubr.bf16.gmra.mrb[4].mxu1 %v574_v0 }
 0x141   : > { %1665 = vmatprep.subr.bf16.mxu0 %v582_v1 }
 0x142   : > { %1666 = vmatpush3.bf16.msra.mxu0 %v582_v1 }
 0x1e3   : > { %v1613_v2 = vpop.f32.mrb[32].mxu0 }
 0x1e4   : > { %v697_v3 = vpop.f32.mrb[33].mxu0  ;;  %v848_v4 = vsel %vm841_vm0, %v1613_v2, -inf }
 0x1e5   : > { %849 = vmax.xlane.f32.xlu1 %v848_v4  ;;  %v1614_v5 = vpop.f32.mrb[34].mxu0  ;;  %v842_v46 = vsel %vm841_vm0, %v697_v3, -inf }
 0x1e6   : > { %843 = vmax.xlane.f32.xlu0 %v842_v46  ;;  %v700_v6 = vpop.f32.mrb[35].mxu0  ;;  %v851_v7 = vsel %vm841_vm0, %v1614_v5, -inf }
 0x1e7   : > { %v845_v48 = vsel %vm841_vm0, %v700_v6, -inf }
 0x1e9   : > { %852 = vmax.xlane.f32.xlu1 %v851_v7 }
 0x1ea   : > { %846 = vmax.xlane.f32.xlu0 %v845_v48 }
 0x1f3   : > { %v2154_v8 = vpop.f32.mrb[36].mxu0 }
 0x1f4   : > { %v713_v9 = vpop.f32.mrb[37].mxu0  ;;  %v860_v14 = vsel %vm841_vm0, %v2154_v8, -inf }
 0x1f5   : > { %v2156_v10 = vpop.f32.mrb[38].mxu0  ;;  %v854_v11 = vsel %vm841_vm0, %v713_v9, -inf }
 0x1f6   : > { %855 = vmax.xlane.f32.xlu0 %v854_v11  ;;  %v716_v12 = vpop.f32.mrb[39].mxu0  ;;  %v863_v15 = vsel %vm841_vm0, %v2156_v10, -inf }
 0x1f7   : > { %v857_v13 = vsel %vm841_vm0, %v716_v12, -inf }
 0x1f8   : > { %858 = vmax.xlane.f32.xlu1 %v857_v13 }
 0x1fa   : > { %861 = vmax.xlane.f32.xlu0 %v860_v14 }
 0x1fc   : > { %864 = vmax.xlane.f32.xlu1 %v863_v15 }
 0x203   : > { %v2164_v16 = vpop.f32.mrb[0].mxu1 }
 0x204   : > { %v2166_v17 = vpop.f32.mrb[1].mxu1  ;;  %v872_v22 = vsel %vm841_vm0, %v2164_v16, -inf }
 0x205   : > { %v2168_v18 = vpop.f32.mrb[2].mxu1  ;;  %v866_v19 = vsel %vm841_vm0, %v2166_v17, -inf }
 0x206   : > { %v2172_v20 = vpop.f32.mrb[3].mxu1  ;;  %867 = vmax.xlane.f32.xlu0 %v866_v19  ;;  %v875_v23 = vsel %vm841_vm0, %v2168_v18, -inf }
 0x207   : > { %v869_v21 = vsel %vm841_vm0, %v2172_v20, -inf }
 0x208   : > { %870 = vmax.xlane.f32.xlu1 %v869_v21 }
 0x20a   : > { %873 = vmax.xlane.f32.xlu0 %v872_v22 }
 0x20c   : > { %876 = vmax.xlane.f32.xlu1 %v875_v23 }
 0x213   : > { %v2180_v24 = vpop.f32.mrb[4].mxu1 }
 0x214   : > { %v2182_v25 = vpop.f32.mrb[5].mxu1  ;;  %v884_v30 = vsel %vm841_vm0, %v2180_v24, -inf }
 0x215   : > { %v2184_v26 = vpop.f32.mrb[6].mxu1  ;;  %v878_v27 = vsel %vm841_vm0, %v2182_v25, -inf }
 0x216   : > { %v2188_v28 = vpop.f32.mrb[7].mxu1  ;;  %879 = vmax.xlane.f32.xlu0 %v878_v27  ;;  %v887_v31 = vsel %vm841_vm0, %v2184_v26, -inf }
 0x217   : > { %v881_v29 = vsel %vm841_vm0, %v2188_v28, -inf }
 0x218   : > { %882 = vmax.xlane.f32.xlu1 %v881_v29 }
 0x21a   : > { %885 = vmax.xlane.f32.xlu0 %v884_v30 }
 0x21c   : > { %888 = vmax.xlane.f32.xlu1 %v887_v31 }
 0x272   : > { %v850_v32 = vpop.xlane.xlu1 %849 }
 0x273   : > { %v892_v33 = vsub.f32 %v1613_v2, %v850_v32  ;;  %v844_v34 = vpop.xlane.xlu0 %843 }
 0x274   : > { %v890_v35 = vsub.f32 %v697_v3, %v844_v34 }
 0x275   : > { %v910_v36 = vmul.f32 1.442695, %v892_v33 }
 0x276   : > { %v906_v37 = vmul.f32 1.442695, %v890_v35  ;;  %v853_v38 = vpop.xlane.xlu1 %852 }
 0x277   : > { %v893_v39 = vsub.f32 %v1614_v5, %v853_v38  ;;  %v847_v40 = vpop.xlane.xlu0 %846 }
 0x278   : > { %1805 = vpow2.f32 %v906_v37  ;;  %v891_v41 = vsub.f32 %v700_v6, %v847_v40 }
 0x279   : > { %1807 = vpow2.f32 %v910_v36  ;;  %v912_v42 = vmul.f32 1.442695, %v893_v39 }
 0x27a   : > { %v908_v43 = vmul.f32 1.442695, %v891_v41 }
 0x27c   : > { %1809 = vpow2.f32 %v908_v43 }
 0x27d   : > { %1811 = vpow2.f32 %v912_v42 }
 0x282   : > { %v2196_v44 = vpop.eup %1805 }
 0x283   : > { %v856_v45 = vpop.xlane.xlu0 %855  ;;  %v938_v47 = vsel %vm841_vm0, %v2196_v44, 0.0  ;;  %v2200_v49 = vpop.eup %1807 }
 0x284   : > { %v894_v50 = vsub.f32 %v713_v9, %v856_v45  ;;  %939 = vadd.xlane.f32.xlu0 %v938_v47  ;;  %v944_v56 = vsel %vm841_vm0, %v2200_v49, 0.0 }
 0x285   : > { %v859_v51 = vpop.xlane.xlu1 %858 }
 0x286   : > { %v2202_v52 = vpop.eup %1809  ;;  %v914_v53 = vmul.f32 1.442695, %v894_v50  ;;  %v895_v54 = vsub.f32 %v716_v12, %v859_v51 }
 0x287   : > { %v862_v55 = vpop.xlane.xlu0 %861  ;;  %v941_v57 = vsel %vm841_vm0, %v2202_v52, 0.0  ;;  %v2208_v58 = vpop.eup %1811 }
 0x288   : > { %1813 = vpow2.f32 %v914_v53  ;;  %v916_v59 = vmul.f32 1.442695, %v895_v54  ;;  %v896_v60 = vsub.f32 %v2154_v8, %v862_v55  ;;  %945 = vadd.xlane.f32.xlu0 %v944_v56  ;;  %942 = vadd.xlane.f32.xlu1 %v941_v57  ;;  %v947_v0 = vsel %vm841_vm0, %v2208_v58, 0.0  ;;  %v1797_v53 = vld [vmem:[%s2398_s4] sm:$0xff]  }
 0x289   : > { %v865_v61 = vpop.xlane.xlu1 %864  ;;  %1675 = vmatprep.subr.bf16.mxu1 %v1797_v53 }
 0x28a   : > { %1815 = vpow2.f32 %v916_v59  ;;  %v918_v62 = vmul.f32 1.442695, %v896_v60  ;;  %v897_v63 = vsub.f32 %v2156_v10, %v865_v61 }
 0x28c   : > { %1817 = vpow2.f32 %v918_v62  ;;  %v920_v1 = vmul.f32 1.442695, %v897_v63  ;;  %948 = vadd.xlane.f32.xlu1 %v947_v0 }
 0x28e   : > { %1819 = vpow2.f32 %v920_v1 }
 0x292   : > { %v2214_v2 = vpop.eup %1813 }
 0x293   : > { %v868_v3 = vpop.xlane.xlu0 %867  ;;  %v950_v4 = vsel %vm841_vm0, %v2214_v2, 0.0 }
 0x294   : > { %v2218_v5 = vpop.eup %1815  ;;  %v898_v46 = vsub.f32 %v2166_v17, %v868_v3  ;;  %951 = vadd.xlane.f32.xlu0 %v950_v4 }
 0x295   : > { %v871_v6 = vpop.xlane.xlu1 %870  ;;  %v953_v7 = vsel %vm841_vm0, %v2218_v5, 0.0 }
 0x296   : > { %v2223_v48 = vpop.eup %1817  ;;  %v922_v8 = vmul.f32 1.442695, %v898_v46  ;;  %v899_v9 = vsub.f32 %v2172_v20, %v871_v6  ;;  %954 = vadd.xlane.f32.xlu1 %v953_v7 }
 0x297   : > { %v874_v10 = vpop.xlane.xlu0 %873  ;;  %v956_v11 = vsel %vm841_vm0, %v2223_v48, 0.0 }
 0x298   : > { %v2228_v12 = vpop.eup %1819  ;;  %1821 = vpow2.f32 %v922_v8  ;;  %v924_v13 = vmul.f32 1.442695, %v899_v9  ;;  %v900_v14 = vsub.f32 %v2164_v16, %v874_v10  ;;  %957 = vadd.xlane.f32.xlu0 %v956_v11 }
 0x299   : > { %v877_v15 = vpop.xlane.xlu1 %876  ;;  %v959_v17 = vsel %vm841_vm0, %v2228_v12, 0.0 }
 0x29a   : > { %1823 = vpow2.f32 %v924_v13  ;;  %v926_v19 = vmul.f32 1.442695, %v900_v14  ;;  %v901_v20 = vsub.f32 %v2168_v18, %v877_v15  ;;  %960 = vadd.xlane.f32.xlu1 %v959_v17  ;;  %v1800_v13 = vld [vmem:[%s2398_s4 + $0x18] sm:$0xff]  }
 0x29c   : > { %1825 = vpow2.f32 %v926_v19  ;;  %v928_v21 = vmul.f32 1.442695, %v901_v20 }
 0x29e   : > { %1827 = vpow2.f32 %v928_v21 }
 0x2a2   : > { %v2234_v22 = vpop.eup %1821 }
 0x2a3   : > { %v880_v23 = vpop.xlane.xlu0 %879  ;;  %v962_v27 = vsel %vm841_vm0, %v2234_v22, 0.0 }
 0x2a4   : > { %v2238_v16 = vpop.eup %1823  ;;  %v902_v29 = vsub.f32 %v2182_v25, %v880_v23  ;;  %963 = vadd.xlane.f32.xlu0 %v962_v27 }
 0x2a5   : > { %v883_v30 = vpop.xlane.xlu1 %882  ;;  %v965_v31 = vsel %vm841_vm0, %v2238_v16, 0.0 }
 0x2a6   : > { %v2243_v18 = vpop.eup %1825  ;;  %v930_v32 = vmul.f32 1.442695, %v902_v29  ;;  %v903_v33 = vsub.f32 %v2188_v28, %v883_v30  ;;  %966 = vadd.xlane.f32.xlu1 %v965_v31 }
 0x2a7   : > { %v886_v34 = vpop.xlane.xlu0 %885  ;;  %v968_v35 = vsel %vm841_vm0, %v2243_v18, 0.0 }
 0x2a8   : > { %v2248_v36 = vpop.eup %1827  ;;  %1829 = vpow2.f32 %v930_v32  ;;  %v932_v37 = vmul.f32 1.442695, %v903_v33  ;;  %v904_v25 = vsub.f32 %v2180_v24, %v886_v34  ;;  %969 = vadd.xlane.f32.xlu0 %v968_v35 }
 0x2a9   : > { %v889_v38 = vpop.xlane.xlu1 %888  ;;  %v971_v39 = vsel %vm841_vm0, %v2248_v36, 0.0 }
 0x2aa   : > { %1831 = vpow2.f32 %v932_v37  ;;  %v934_v40 = vmul.f32 1.442695, %v904_v25  ;;  %v905_v28 = vsub.f32 %v2184_v26, %v889_v38  ;;  %972 = vadd.xlane.f32.xlu1 %v971_v39 }
 0x2ac   : > { %1833 = vpow2.f32 %v934_v40  ;;  %v936_v41 = vmul.f32 1.442695, %v905_v28 }
 0x2ae   : > { %1835 = vpow2.f32 %v936_v41 }
 0x2b2   : > { %v2254_v42 = vpop.eup %1829 }
 0x2b3   : > { %v974_v43 = vsel %vm841_vm0, %v2254_v42, 0.0 }
 0x2b4   : > { %v2258_v45 = vpop.eup %1831  ;;  %975 = vadd.xlane.f32.xlu0 %v974_v43 }
 0x2b5   : > { %v977_v24 = vsel %vm841_vm0, %v2258_v45, 0.0 }
 0x2b6   : > { %v2262_v47 = vpop.eup %1833  ;;  %978 = vadd.xlane.f32.xlu1 %v977_v24 }
 0x2b7   : > { %v980_v26 = vsel %vm841_vm0, %v2262_v47, 0.0 }
 0x2b8   : > { %v2266_v50 = vpop.eup %1835  ;;  %981 = vadd.xlane.f32.xlu0 %v980_v26 }
 0x2b9   : > { %v983_v51 = vsel %vm841_vm0, %v2266_v50, 0.0 }
 0x2ba   : > { %984 = vadd.xlane.f32.xlu1 %v983_v51 }
 0x311   : > { %v940_v54 = vpop.xlane.xlu0 %939 }
 0x312   : > { %1837 = vrcp.f32 %v940_v54 }
 0x315   : > { %v946_v55 = vpop.xlane.xlu0 %945  ;;  %v943_v56 = vpop.xlane.xlu1 %942 }
 0x316   : > { %1839 = vrcp.f32 %v943_v56  ;;  %v1804_v56 = vld [vmem:[%s2398_s4 + $0x38] sm:$0xff]  }
 0x317   : > { %1841 = vrcp.f32 %v946_v55 }
 0x319   : > { %v949_v57 = vpop.xlane.xlu1 %948 }
 0x31a   : > { %1843 = vrcp.f32 %v949_v57 }
 0x31c   : > { %v1838_v59 = vpop.eup %1837 }
 0x31d   : > { %v1002_v63 = vmul.f32 %v1838_v59, %v2196_v44  ;;  %v1798_v44 = vld [vmem:[%s2398_s4 + $0x8] sm:$0xff]  }
 0x320   : > { %v1840_v60 = vpop.eup %1839 }
 0x321   : > { %v952_v61 = vpop.xlane.xlu0 %951  ;;  %v1842_v62 = vpop.eup %1841  ;;  %v1003_v0 = vmul.f32 %v1840_v60, %v2202_v52 }
 0x322   : > { %1845 = vrcp.f32 %v952_v61  ;;  %v1004_v46 = vmul.f32 %v1842_v62, %v2200_v49  ;;  %v1799_v49 = vld [vmem:[%s2398_s4 + $0x10] sm:$0xff]  }
 0x323   : > { %v955_v1 = vpop.xlane.xlu1 %954  ;;  %v1018_v4 = vpack.c.bf16 %v1003_v0, %v1002_v63 }
 0x324   : > { %v1844_v3 = vpop.eup %1843  ;;  %1847 = vrcp.f32 %v955_v1 }
 0x325   : > { %v1005_v6 = vmul.f32 %v1844_v3, %v2208_v58  ;;  %v958_v7 = vpop.xlane.xlu0 %957  ;;  %1651 = vmatprep.mubr.msk.bf16.mxu1 %vm841_vm0, %v1018_v4 }
 0x326   : > { %1849 = vrcp.f32 %v958_v7 }
 0x327   : > { %v1019_v8 = vpack.c.bf16 %v1005_v6, %v1004_v46  ;;  %v961_v9 = vpop.xlane.xlu1 %960 }
 0x328   : > { %1851 = vrcp.f32 %v961_v9 }
 0x329   : > { %1652 = vmatmul.mubr.msk.bf16.vlgmr.msra.gmra.mrb[8].mxu1 %vm841_vm0, %v1019_v8 }
 0x32a   : > { %1676 = vmatpush3.bf16.msra.mxu1 %v1797_v53 }
 0x32b   : > { %1677 = vmatprep.subr.bf16.mxu1 %v1798_v44 }
 0x32c   : > { %v1846_v52 = vpop.eup %1845 }
 0x32d   : > { %v1006_v10 = vmul.f32 %v1846_v52, %v2214_v2 }
 0x32e   : > { %v1848_v58 = vpop.eup %1847  ;;  %1678 = vmatpush3.bf16.msra.mxu1 %v1798_v44 }
 0x32f   : > { %v1007_v11 = vmul.f32 %v1848_v58, %v2218_v5  ;;  %1679 = vmatprep.subr.bf16.mxu1 %v1799_v49  ;;  %v1801_v5 = vld [vmem:[%s2398_s4 + $0x20] sm:$0xff]  }
 0x330   : > { %v1850_v14 = vpop.eup %1849 }
 0x331   : > { %v964_v15 = vpop.xlane.xlu0 %963  ;;  %v1020_v17 = vpack.c.bf16 %v1007_v11, %v1006_v10  ;;  %v1008_v21 = vmul.f32 %v1850_v14, %v2223_v48  ;;  %v1802_v48 = vld [vmem:[%s2398_s4 + $0x28] sm:$0xff]   ;;  %v1520_v11 = vld [vmem:[%s2399_s5] ss:$0 sm:$0xff] }
 0x332   : > { %v1852_v19 = vpop.eup %1851  ;;  %1853 = vrcp.f32 %v964_v15  ;;  %1680 = vmatpush3.bf16.msra.mxu1 %v1799_v49 }
 0x333   : > { %1655 = vmatprep.mubr.msk.bf16.mxu1 %vm841_vm0, %v1020_v17  ;;  %v967_v20 = vpop.xlane.xlu1 %966  ;;  %v1009_v2 = vmul.f32 %v1852_v19, %v2228_v12  ;;  %1681 = vmatprep.subr.bf16.mxu1 %v1800_v13  ;;  %v1803_v12 = vld [vmem:[%s2398_s4 + $0x30] sm:$0xff]  }
 0x334   : > { %1855 = vrcp.f32 %v967_v20 }
 0x335   : > { %v970_v23 = vpop.xlane.xlu0 %969  ;;  %v1021_v27 = vpack.c.bf16 %v1009_v2, %v1008_v21 }
 0x336   : > { %1857 = vrcp.f32 %v970_v23  ;;  %1682 = vmatpush3.bf16.msra.mxu1 %v1800_v13 }
 0x337   : > { %1656 = vmatmul.mubr.msk.bf16.gmra.mrb[12].mxu1 %vm841_vm0, %v1021_v27  ;;  %v973_v29 = vpop.xlane.xlu1 %972  ;;  %1683 = vmatprep.subr.bf16.mxu1 %v1801_v5 }
 0x338   : > { %1859 = vrcp.f32 %v973_v29 }
 0x33a   : > { %1684 = vmatpush3.bf16.msra.mxu1 %v1801_v5 }
 0x33b   : > { %1685 = vmatprep.subr.bf16.mxu1 %v1802_v48 }
 0x33c   : > { %v1854_v30 = vpop.eup %1853 }
 0x33d   : > { %v1010_v32 = vmul.f32 %v1854_v30, %v2234_v22 }
 0x33e   : > { %v1856_v31 = vpop.eup %1855  ;;  %1686 = vmatpush3.bf16.msra.mxu1 %v1802_v48 }
 0x33f   : > { %v1011_v33 = vmul.f32 %v1856_v31, %v2238_v16  ;;  %1687 = vmatprep.subr.bf16.mxu1 %v1803_v12 }
 0x340   : > { %v1858_v34 = vpop.eup %1857 }
 0x341   : > { %v976_v35 = vpop.xlane.xlu0 %975  ;;  %v1022_v37 = vpack.c.bf16 %v1011_v33, %v1010_v32  ;;  %v1012_v38 = vmul.f32 %v1858_v34, %v2243_v18 }
 0x342   : > { %v1860_v25 = vpop.eup %1859  ;;  %1861 = vrcp.f32 %v976_v35  ;;  %1688 = vmatpush3.bf16.msra.mxu1 %v1803_v12 }
 0x343   : > { %v1013_v39 = vmul.f32 %v1860_v25, %v2248_v36  ;;  %1667 = vmatprep.mubr.msk.bf16.mxu0 %vm841_vm0, %v1022_v37  ;;  %v979_v40 = vpop.xlane.xlu1 %978  ;;  %1689 = vmatprep.subr.bf16.mxu1 %v1804_v56 }
 0x344   : > { %1863 = vrcp.f32 %v979_v40 }
 0x345   : > { %v1023_v28 = vpack.c.bf16 %v1013_v39, %v1012_v38  ;;  %v982_v41 = vpop.xlane.xlu0 %981 }
 0x346   : > { %1865 = vrcp.f32 %v982_v41  ;;  %1690 = vmatpush3.bf16.msra.mxu1 %v1804_v56 }
 0x347   : > { %1668 = vmatmul.mubr.msk.bf16.vlgmr.msra.gmra.mrb[40].mxu0 %vm841_vm0, %v1023_v28  ;;  %v985_v22 = vpop.xlane.xlu1 %984 }
 0x348   : > { %1867 = vrcp.f32 %v985_v22 }
 0x34c   : > { %v1862_v16 = vpop.eup %1861 }
 0x34d   : > { %v1014_v24 = vmul.f32 %v1862_v16, %v2254_v42 }
 0x34e   : > { %v1864_v43 = vpop.eup %1863 }
 0x34f   : > { %v1015_v26 = vmul.f32 %v1864_v43, %v2258_v45 }
 0x350   : > { %v1866_v18 = vpop.eup %1865 }
 0x351   : > { %v1024_v51 = vpack.c.bf16 %v1015_v26, %v1014_v24  ;;  %v1016_v53 = vmul.f32 %v1866_v18, %v2262_v47 }
 0x352   : > { %v1868_v36 = vpop.eup %1867 }
 0x353   : > { %1671 = vmatprep.mubr.msk.bf16.mxu0 %vm841_vm0, %v1024_v51  ;;  %v1017_v54 = vmul.f32 %v1868_v36, %v2266_v50 }
 0x355   : > { %v1025_v55 = vpack.c.bf16 %v1017_v54, %v1016_v53 }
 0x357   : > { %1672 = vmatmul.mubr.msk.bf16.gmra.mrb[44].mxu0 %vm841_vm0, %v1025_v55 }
 0x3fc   : > { %v1653_v42 = vpop.f32.mrb[8].mxu1 }
 0x3fd   : > { %v1072_v45 = vpop.f32.mrb[9].mxu1 }
 0x3fe   : > { %v1654_v57 = vpop.f32.mrb[10].mxu1 }
 0x3ff   : > { %v1181_v59 = vpack.c.bf16 %v1654_v57, %v1653_v42  ;;  %v1075_v60 = vpop.f32.mrb[11].mxu1 }
 0x400   : > { %v1180_v61 = vpack.c.bf16 %v1075_v60, %v1072_v45 }
 0x402   : > { %1691 = vmatprep.mubr.bf16.mxu1 %v1180_v61 }
 0x403   : > { %1692 = vmatmul.mubr.bf16.vlgmr.msra.gmra.mrb[16].mxu1 %v1181_v59 }
 0x40a   : > { %v1657_v47 = vpop.f32.mrb[12].mxu1 }
 0x40b   : > { %v1088_v62 = vpop.f32.mrb[13].mxu1 }
 0x40c   : > { %v1658_v50 = vpop.f32.mrb[14].mxu1 }
 0x40d   : > { %v1183_v63 = vpack.c.bf16 %v1658_v50, %v1657_v47  ;;  %v1091_v0 = vpop.f32.mrb[15].mxu1 }
 0x40e   : > { %v1182_v1 = vpack.c.bf16 %v1091_v0, %v1088_v62 }
 0x410   : > { %1695 = vmatprep.mubr.bf16.mxu1 %v1182_v1 }
 0x411   : > { %1696 = vmatmul.mubr.bf16.gmra.mrb[20].mxu1 %v1183_v63 }
 0x41a   : > { %v1669_v3 = vpop.f32.mrb[40].mxu0 }
 0x41b   : > { %v1149_v4 = vpop.f32.mrb[41].mxu0 }
 0x41c   : > { %v1670_v46 = vpop.f32.mrb[42].mxu0 }
 0x41d   : > { %v1185_v6 = vpack.c.bf16 %v1670_v46, %v1669_v3  ;;  %v1152_v7 = vpop.f32.mrb[43].mxu0 }
 0x41e   : > { %v1184_v8 = vpack.c.bf16 %v1152_v7, %v1149_v4 }
 0x420   : > { %1699 = vmatprep.mubr.bf16.mxu1 %v1184_v8 }
 0x421   : > { %1700 = vmatmul.mubr.bf16.gmra.mrb[24].mxu1 %v1185_v6 }
 0x42a   : > { %v1673_v9 = vpop.f32.mrb[44].mxu0 }
 0x42b   : > { %v1165_v44 = vpop.f32.mrb[45].mxu0 }
 0x42c   : > { %v1674_v49 = vpop.f32.mrb[46].mxu0 }
 0x42d   : > { %v1187_v52 = vpack.c.bf16 %v1674_v49, %v1673_v9  ;;  %v1168_v58 = vpop.f32.mrb[47].mxu0 }
 0x42e   : > { %v1186_v10 = vpack.c.bf16 %v1168_v58, %v1165_v44 }
 0x430   : > { %1703 = vmatprep.mubr.bf16.mxu1 %v1186_v10 }
 0x431   : > { %1704 = vmatmul.mubr.bf16.gmra.mrb[28].mxu1 %v1187_v52 }
 0x4d6   : > { %v1693_v13 = vpop.f32.mrb[16].mxu1 }
 0x4d7   : > { %v1302_v14 = vadd.f32 %v1693_v13, %v1520_v11  ;;  %v1293_v15 = vpop.f32.mrb[17].mxu1 }
 0x4d8   : > { %v1294_v17 = vadd.f32 %v1520_v11, %v1293_v15  ;;  %v1694_v19 = vpop.f32.mrb[18].mxu1 }
 0x4d9   : > { %1358 = vst [vmem:[%s2324_s11 + $0x10] sm:$0xff] %v1302_v14  ;;  %v1305_v20 = vadd.f32 %v1694_v19, %v1520_v11  ;;  %v1296_v21 = vpop.f32.mrb[19].mxu1 }
 0x4da   : > { %1356 = vst [vmem:[%s2324_s11] sm:$0xff] %v1294_v17  ;;  %v1297_v2 = vadd.f32 %v1520_v11, %v1296_v21 }
 0x4db   : > { %1359 = vst [vmem:[%s2324_s11 + $0x18] sm:$0xff] %v1305_v20 }
 0x4dc   : > { %1357 = vst [vmem:[%s2324_s11 + $0x8] sm:$0xff] %v1297_v2 }
 0x4e4   : > { %v1697_v5 = vpop.f32.mrb[20].mxu1 }
 0x4e5   : > { %v1318_v23 = vadd.f32 %v1697_v5, %v1520_v11  ;;  %v1309_v27 = vpop.f32.mrb[21].mxu1 }
 0x4e6   : > { %v1310_v29 = vadd.f32 %v1520_v11, %v1309_v27  ;;  %v1698_v48 = vpop.f32.mrb[22].mxu1 }
 0x4e7   : > { %1362 = vst [vmem:[%s2324_s11 + $0x30] sm:$0xff] %v1318_v23  ;;  %v1321_v12 = vadd.f32 %v1698_v48, %v1520_v11  ;;  %v1312_v30 = vpop.f32.mrb[23].mxu1 }
 0x4e8   : > { %1360 = vst [vmem:[%s2324_s11 + $0x20] sm:$0xff] %v1310_v29  ;;  %v1313_v31 = vadd.f32 %v1520_v11, %v1312_v30 }
 0x4e9   : > { %1363 = vst [vmem:[%s2324_s11 + $0x38] sm:$0xff] %v1321_v12 }
 0x4ea   : > { %1361 = vst [vmem:[%s2324_s11 + $0x28] sm:$0xff] %v1313_v31 }
 0x4f4   : > { %v1701_v32 = vpop.f32.mrb[24].mxu1 }
 0x4f5   : > { %v1334_v33 = vadd.f32 %v1701_v32, %v1520_v11  ;;  %v1325_v34 = vpop.f32.mrb[25].mxu1 }
 0x4f6   : > { %v1326_v35 = vadd.f32 %v1520_v11, %v1325_v34  ;;  %v1702_v37 = vpop.f32.mrb[26].mxu1 }
 0x4f7   : > { %1366 = vst [vmem:[%s2324_s11 + $0x50] sm:$0xff] %v1334_v33  ;;  %v1337_v25 = vadd.f32 %v1702_v37, %v1520_v11  ;;  %v1328_v38 = vpop.f32.mrb[27].mxu1 }
 0x4f8   : > { %1364 = vst [vmem:[%s2324_s11 + $0x40] sm:$0xff] %v1326_v35  ;;  %v1329_v39 = vadd.f32 %v1520_v11, %v1328_v38 }
 0x4f9   : > { %1367 = vst [vmem:[%s2324_s11 + $0x58] sm:$0xff] %v1337_v25 }
 0x4fa   : > { %1365 = vst [vmem:[%s2324_s11 + $0x48] sm:$0xff] %v1329_v39 }
 0x504   : > { %v1705_v40 = vpop.f32.mrb[28].mxu1 }
 0x505   : > { %v1350_v28 = vadd.f32 %v1705_v40, %v1520_v11  ;;  %v1341_v41 = vpop.f32.mrb[29].mxu1 }
 0x506   : > { %v1342_v22 = vadd.f32 %v1520_v11, %v1341_v41  ;;  %v1706_v16 = vpop.f32.mrb[30].mxu1 }
 0x507   : > { %1370 = vst [vmem:[%s2324_s11 + $0x70] sm:$0xff] %v1350_v28  ;;  %v1353_v43 = vadd.f32 %v1706_v16, %v1520_v11  ;;  %v1344_v24 = vpop.f32.mrb[31].mxu1 }
 0x508   : > { %1368 = vst [vmem:[%s2324_s11 + $0x60] sm:$0xff] %v1342_v22  ;;  %v1345_v26 = vadd.f32 %v1520_v11, %v1344_v24 }
 0x509   : > { %1371 = vst [vmem:[%s2324_s11 + $0x78] sm:$0xff] %v1353_v43 }
 0x50a   : > { %1369 = vst [vmem:[%s2324_s11 + $0x68] sm:$0xff] %v1345_v26 }
 0x50b   : > { %1882 = shalt.err (!%p1879_p3)
}
 0x50c   : > { %s1883_s29 = scalar_lea.hbm %s2344_s19, 2048  ;;  %s1887_s12 = scalar_lea.hbm %s2400_s6, 4096 }
 0x50d   : > { %p1884_p4 = scmp.ne.s32.totalorder %s2344_s19, %s1883_s29  ;;  %p1888_p9 = scmp.lt.u32.totalorder %s2344_s19, %s2400_s6 }
 0x50e   : > { %p1889_p10 = scmp.lt.u32.totalorder %s1887_s12, %s1883_s29  ;;  %p1891_p12 = scmp.lt.u32.totalorder %s1883_s29, %s2344_s19 }
 0x50f   : > { %p1885_p7 = pnand %p1884_p4, %p2010_p5 }
 0x510   : > { %p1890_p11 = por %p1889_p10, %p1888_p9 }
 0x511   : > { %p1886_p8 = pneg %p1885_p7 }
 0x512   : > { %p1892_p13 = por %p1891_p12, %p1890_p11 }
 0x514   : > { %p1893_p0 = pnand %p1892_p13, %p1886_p8 }
 0x516   : > { %1896 = shalt.err (!%p1893_p0)
}
 0x517   : > { %s1935_s15 = smov 128   ;;  %s1936_s17 = smov 8  }
 0x518   : > { %1707 = dma.vmem_to_hbm [thread:$0]  (%p2010_p5), %s2346_s16, 2048, %s2344_s19, %s2353_s25, %s1935_s15, %s1935_s15, %s1936_s17  }
 0x519 PF: > { %p1713_p1 = scmp.ge.s32.totalorder %s1931_s24, 2  ;;  %s1402_s18 = sand.u32 1, %s1919_s21  }
 0x51a   : > { %s1403_s26 = scalar_lea.sflag [#allocation3], %s1402_s18 }
 0x51b   : > { %p1710_p2 = pnand %p1713_p1, %p2014_p6 }
 0x51d   : > { %1914 = dma.done.wait (!%p1710_p2), %s1403_s26, 2048  }
 0x51e   : > { %1916 = vsyncadd (!%p1710_p2), %s1403_s26, 4294965248  ;;  %p16_p3 = scmp.ge.s32.totalorder %s1997_s27, 4   ;;  %s2403_s21 = smov %s1923_s22 }
 0x51f   : > { %s2404_s22 = smov %s1927_s23  ;;  %s2405_s23 = smov %s2008_s30 }
 0x520   : > { %s2406_s24 = smov %s1997_s27  ;;  %18 = sbr.rel (!%p16_p3) target bundleno = 3 (0x3), region = 82 }
 0x527   :  { %1408 = vsyncpa [#allocation3], 1 }
 0x528   :  { %1410 = vsyncpa [#allocation3 + $0x1], 1 }

</bundles_post_ra>
